<compile_context>
chip_gen: v7x
topology: tpu7x:2x2x1
jax: 0.10.0
libtpu: 0.0.40
codegen_flags: <defaults>
</compile_context>

<pallas_src>
import jax
import jax.numpy as jnp
from jax.experimental import pallas as pl
from jax.experimental.pallas import tpu as pltpu


def _round_up(x, m):
    return (x + m - 1) // m * m


def patch_embed_kernel(x_ref, w_ref, b_ref, o_ref):
    # x_ref: (tm, K) bf16, w_ref: (K, N) bf16, b_ref: (1, N) f32,
    # o_ref: (tm, N) bf16. Accumulate + bias in f32, cast on the final store.
    acc = jnp.dot(x_ref[...], w_ref[...], preferred_element_type=jnp.float32)
    o_ref[...] = (acc + b_ref[...]).astype(o_ref.dtype)


def patch_embed(x, weight, bias, patch_size, *, tm=1024,
                compute_dtype=jnp.bfloat16, out_dtype=jnp.bfloat16):
    """x: (B, C, H, W); weight: (E, C, p, p); bias: (E,).

    Returns (B, n_patches, E), matching PyTorch
    Conv2d(C, E, kernel_size=p, stride=p)(x).flatten(2).transpose(1, 2)
    (with bf16 compute / output).
    """
    B, C, H, W = x.shape
    p = patch_size
    E = weight.shape[0]
    hp, wp = H // p, W // p
    n_patches = hp * wp

    # --- patch extraction, (C, ph, pw) flatten order -------------------------
    # Kept as JAX glue; with allow_input_fusion XLA may fold this transpose +
    # cast directly into the Pallas input DMA instead of materializing xp.
    xp = x.reshape(B, C, hp, p, wp, p)
    xp = jnp.transpose(xp, (0, 2, 4, 1, 3, 5))
    xp = xp.reshape(B * n_patches, C * p * p).astype(compute_dtype)

    # Conv weight (E, C, p, p) -> matmul weight (C*p*p, E); bias as (1, E) f32.
    w2d = weight.reshape(E, C * p * p).T.astype(compute_dtype)
    b2d = bias.reshape(1, E).astype(jnp.float32)

    M, K = xp.shape
    N = E

    # Tile over M only; K / N blocks span the full arrays (no padding needed:
    # full-extent block dims satisfy the (8,128) rule, and in production ViT
    # configs K and E are already multiples of 128 -> lane-dense stores).
    tm = min(tm, _round_up(M, 8))
    grid_m = pl.cdiv(M, tm)

    cost = pl.CostEstimate(
        flops=2 * M * K * N,
        bytes_accessed=(xp.size * jnp.dtype(compute_dtype).itemsize
                        + w2d.size * jnp.dtype(compute_dtype).itemsize
                        + b2d.size * 4
                        + M * N * jnp.dtype(out_dtype).itemsize),
        transcendentals=0,
    )

    out = pl.pallas_call(
        patch_embed_kernel,
        out_shape=jax.ShapeDtypeStruct((M, N), out_dtype),
        grid_spec=pltpu.PrefetchScalarGridSpec(
            num_scalar_prefetch=0,
            grid=(grid_m,),
            in_specs=[
                # Activation tiles stream over M (double-buffered by Pallas;
                # boundary block masked automatically when tm does not divide M).
                pl.BlockSpec((tm, K), lambda i: (i, 0)),
                # Weight / bias: constant block index -> resident in VMEM,
                # DMA'd once for the whole grid.
                pl.BlockSpec((K, N), lambda i: (0, 0)),
                pl.BlockSpec((1, N), lambda i: (0, 0)),
            ],
            out_specs=pl.BlockSpec((tm, N), lambda i: (i, 0)),
        ),
        compiler_params=pltpu.CompilerParams(
            # Independent M tiles -> shard across TensorCores on v7x megacore.
            dimension_semantics=("parallel",),
            # Explicit scoped-VMEM budget: ~8-9 MB working set at tm=1024,
            # K=N=768, bf16 out; 32 MiB fits v5e/v6e/v7x alike.
            vmem_limit_bytes=32 * 1024 * 1024,
            # Allow XLA to fuse the patch-extract transpose/cast producer into
            # the activation operand (drops an HBM round trip when supported).
            allow_input_fusion=[True, False, False],
        ),
        cost_estimate=cost,
    )(xp, w2d, b2d)

    return out.reshape(B, n_patches, E)


if __name__ == "__main__":
    # Small shapes consistent with the module: img_size=16, patch_size=4,
    # in_chans=4, embed_dim=32, batch=2  -> n_patches = (16//4)**2 = 16.
    B, C, H, W = 2, 4, 16, 16
    patch_size = 4
    embed_dim = 32

    key = jax.random.PRNGKey(0)
    kx, kw, kb = jax.random.split(key, 3)

    x = jax.random.normal(kx, (B, C, H, W), dtype=jnp.float32)
    # Deterministic "Conv2d" parameters (synthetic init, PyTorch-shaped).
    fan_in = C * patch_size * patch_size
    bound = 1.0 / (fan_in ** 0.5)
    weight = jax.random.uniform(
        kw, (embed_dim, C, patch_size, patch_size),
        minval=-bound, maxval=bound, dtype=jnp.float32)
    bias = jax.random.uniform(
        kb, (embed_dim,), minval=-bound, maxval=bound, dtype=jnp.float32)

    fn = jax.jit(lambda xx, ww, bb: patch_embed(xx, ww, bb, patch_size))
    out = jax.block_until_ready(fn(x, weight, bias))

    n_patches = (H // patch_size) * (W // patch_size)
    assert out.shape == (B, n_patches, embed_dim)
    assert out.dtype == jnp.bfloat16
    out_f32 = out.astype(jnp.float32)

    # Reference 1: same bf16-quantized inputs, f32 accumulation (tight check of
    # patch ordering / kernel math; extra slack for the bf16 output cast).
    ref_bf16 = jax.lax.conv_general_dilated(
        x.astype(jnp.bfloat16), weight.astype(jnp.bfloat16),
        window_strides=(patch_size, patch_size), padding="VALID",
        dimension_numbers=("NCHW", "OIHW", "NCHW"),
        preferred_element_type=jnp.float32)
    ref_bf16 = ref_bf16 + bias.reshape(1, embed_dim, 1, 1)
    ref_bf16 = ref_bf16.reshape(B, embed_dim, -1).transpose(0, 2, 1)
    assert jnp.allclose(out_f32, ref_bf16, atol=2e-2, rtol=2e-2)

    # Reference 2: full-f32 conv (loose check; difference is only the intended
    # bf16 input / output quantization).
    ref_f32 = jax.lax.conv_general_dilated(
        x, weight, window_strides=(patch_size, patch_size), padding="VALID",
        dimension_numbers=("NCHW", "OIHW", "NCHW"))
    ref_f32 = ref_f32 + bias.reshape(1, embed_dim, 1, 1)
    ref_f32 = ref_f32.reshape(B, embed_dim, -1).transpose(0, 2, 1)
    assert jnp.allclose(out_f32, ref_f32, atol=6e-2, rtol=6e-2)

    print("KERNEL_OK")
</pallas_src>

<mosaic_0001>
module attributes {stable_mosaic.version = 11 : i64} {
  func.func @patch_embed_kernel(%arg0: i32, %arg1: memref<32x64xbf16, #tpu.memory_space<vmem>>, %arg2: memref<64x32xbf16, #tpu.memory_space<vmem>>, %arg3: memref<1x32xf32, #tpu.memory_space<vmem>>, %arg4: memref<32x32xbf16, #tpu.memory_space<vmem>>) attributes {dimension_semantics = [#tpu.dimension_semantics<parallel>], iteration_bounds = array<i64: 1>, scalar_prefetch = 0 : i64, scratch_operands = 0 : i64, tpu.core_type = #tpu.core_type<tc>, window_params = [{transform_indices = @transform_0, window_bounds = array<i64: 32, 64>}, {pipeline_mode = #tpu.pipeline_mode<synchronous>, transform_indices = @transform_1, window_bounds = array<i64: 64, 32>}, {pipeline_mode = #tpu.pipeline_mode<synchronous>, transform_indices = @transform_2, window_bounds = array<i64: 1, 32>}, {transform_indices = @transform_3, window_bounds = array<i64: 32, 32>}]} {
    %c0 = arith.constant 0 : index
    %c0_0 = arith.constant 0 : index
    %0 = vector.load %arg1[%c0, %c0_0] : memref<32x64xbf16, #tpu.memory_space<vmem>>, vector<32x64xbf16>
    %c0_1 = arith.constant 0 : index
    %c0_2 = arith.constant 0 : index
    %1 = vector.load %arg2[%c0_1, %c0_2] : memref<64x32xbf16, #tpu.memory_space<vmem>>, vector<64x32xbf16>
    %cst = arith.constant dense<0.000000e+00> : vector<32x32xf32>
    %2 = tpu.matmul %0, %1, %cst {dimension_numbers = #tpu.dot_dimension_numbers<[1], [0], [0], [1], [0, 0, 1, 1], [], []>} : vector<32x64xbf16>, vector<64x32xbf16>, vector<32x32xf32> -> vector<32x32xf32>
    %c0_3 = arith.constant 0 : index
    %c0_4 = arith.constant 0 : index
    %3 = vector.load %arg3[%c0_3, %c0_4] : memref<1x32xf32, #tpu.memory_space<vmem>>, vector<1x32xf32>
    %4 = vector.broadcast %3 : vector<1x32xf32> to vector<32x32xf32>
    %5 = arith.addf %2, %4 : vector<32x32xf32>
    %6 = arith.truncf %5 : vector<32x32xf32> to vector<32x32xbf16>
    %c0_5 = arith.constant 0 : index
    %c0_6 = arith.constant 0 : index
    %7 = vector.load %arg4[%c0_5, %c0_6] : memref<32x32xbf16, #tpu.memory_space<vmem>>, vector<32x32xbf16>
    tpu.vector_store %arg4[%c0_5, %c0_6], %6 {strides = array<i32>} : memref<32x32xbf16, #tpu.memory_space<vmem>>, vector<32x32xbf16>,
    return
  }
  func.func @transform_0(%arg0: i32) -> (i32, i32) {
    %c0_i32 = arith.constant 0 : i32
    %c0_i32_0 = arith.constant 0 : i32
    return %arg0, %c0_i32 : i32, i32
  }
  func.func @transform_1(%arg0: i32) -> (i32, i32) {
    %c0_i32 = arith.constant 0 : i32
    %c0_i32_0 = arith.constant 0 : i32
    %c0_i32_1 = arith.constant 0 : i32
    return %c0_i32, %c0_i32_0 : i32, i32
  }
  func.func @transform_2(%arg0: i32) -> (i32, i32) {
    %c0_i32 = arith.constant 0 : i32
    %c0_i32_0 = arith.constant 0 : i32
    %c0_i32_1 = arith.constant 0 : i32
    return %c0_i32, %c0_i32_0 : i32, i32
  }
  func.func @transform_3(%arg0: i32) -> (i32, i32) {
    %c0_i32 = arith.constant 0 : i32
    %c0_i32_0 = arith.constant 0 : i32
    return %arg0, %c0_i32 : i32, i32
  }
}

</mosaic_0001>

<bundles_post_ra>
// kernel: _lambda_.1
= control target key start
LH: loop header
LB: loop body
LE: loop exit
PB: predicated region body
PF: predicated region fallthrough
CT: control target
= control target key end

     0   :  { %vm69_vm0 = vcmask 523264   ;;  %s290_s0 = inlined_call_operand.vmem [shape: bf16[32,64], index: 0, kind: input, shape index: {}]   ;;  %s291_s1 = inlined_call_operand.vmem [shape: bf16[64,32], index: 1, kind: input, shape index: {}]   ;;  %s292_s2 = inlined_call_operand.vmem [shape: f32[1,32], index: 2, kind: input, shape index: {}]   ;;  %s293_s3 = inlined_call_operand.hbm [shape: bf16[32,32], index: 3, kind: output, shape index: {}]  }
   0x1   :  { %v200_v0 = vld [vmem:[%s291_s1] sm:$0xff]   ;;  %v201_v1 = vld [vmem:[%s291_s1 + $0x8] sm:$0xff]   ;;  %v202_v2 = vld [vmem:[%s291_s1 + $0x10] sm:$0xff]  }
   0x2   :  { %185 = vmatprep.subr.bf16.mxu0 %v200_v0  ;;  %v204_v3 = vld [vmem:[%s290_s0] sm:$0xff]  }
   0x3   :  { %186 = vmatpush3.bf16.msra.mxu0 %v200_v0  ;;  %193 = vmatprep.mubr.msk.bf16.mxu0 %vm69_vm0, %v204_v3 }
   0x4   :  { %187 = vmatprep.subr.bf16.mxu0 %v201_v1 }
   0x5   :  { %8 = vsyncpa [#allocation3], 0  ;;  %v203_v4 = vld [vmem:[%s291_s1 + $0x18] sm:$0xff]   ;;  %v205_v5 = vld [vmem:[%s290_s0 + $0x8] sm:$0xff]   ;;  %vm141_vm1 = vcmask 257024   ;;  %s230_s26 = smov [#allocation2]  }
   0x6   :  { %v162_v6 = vld [vmem:[%s292_s2] ss:$0 sm:$0xff]  ;;  %s151_s1 = sshll.u32 %s230_s26, 4  ;;  %s152_s1 = int_to_ptr.vmem [resolvable:$true] %s151_s1 }
   0x7   :  { %188 = vmatpush3.bf16.msra.mxu0 %v201_v1  ;;  %s206_s0 = scalar_lea.vmem %s152_s1, 256  ;;  %p211_p1 = scmp.lt.s32.totalorder %s152_s1, %s152_s1 }
   0x8   :  { %189 = vmatprep.subr.bf16.mxu0 %v202_v2  ;;  %p207_p0 = scmp.ne.s32.totalorder %s152_s1, %s206_s0  ;;  %p212_p2 = scmp.lt.s32.totalorder %s206_s0, %s206_s0 }
   0xa   :  { %p213_p3 = por %p212_p2, %p211_p1 }
   0xb   :  { %190 = vmatpush3.bf16.msra.mxu0 %v202_v2 }
   0xc   :  { %191 = vmatprep.subr.bf16.mxu0 %v203_v4  ;;  %p214_p4 = pnand %p213_p3, %p207_p0 }
   0xf   :  { %192 = vmatpush3.bf16.msra.mxu0 %v203_v4 }
  0x12   :  { %194 = vmatmul.mubr.msk.bf16.vlgmr.msra.gmra.mrb[0].mxu0 %vm69_vm0, %v205_v5 }
  0xe5   :  { %v195_v7 = vpop.f32.mrb[0].mxu0 }
  0xe6   :  { %v119_v8 = vadd.f32 %v195_v7, %v162_v6  ;;  %v110_v9 = vpop.f32.mrb[1].mxu0 }
  0xe7   :  { %v111_v10 = vadd.f32 %v162_v6, %v110_v9  ;;  %v196_v11 = vpop.f32.mrb[2].mxu0 }
  0xe8   :  { %v177_v12 = vpack.c.bf16 %v119_v8, %v119_v8  ;;  %v122_v13 = vadd.f32 %v196_v11, %v162_v6  ;;  %v113_v14 = vpop.f32.mrb[3].mxu0 }
  0xe9   :  { %v175_v15 = vpack.c.bf16 %v111_v10, %v111_v10  ;;  %v114_v16 = vadd.f32 %v162_v6, %v113_v14 }
  0xea   :  { %144 = vst.msk [vmem:[#allocation2 + $0x8] sm:$0xf] %vm141_vm1, %v177_v12  ;;  %v178_v17 = vpack.c.bf16 %v122_v13, %v122_v13 }
  0xeb   :  { %142 = vst.msk [vmem:[#allocation2] sm:$0xf] %vm141_vm1, %v175_v15  ;;  %v176_v18 = vpack.c.bf16 %v114_v16, %v114_v16 }
  0xec   :  { %145 = vst.msk [vmem:[#allocation2 + $0xc] sm:$0xf] %vm141_vm1, %v178_v17 }
  0xed   :  { %143 = vst.msk [vmem:[#allocation2 + $0x4] sm:$0xf] %vm141_vm1, %v176_v18 }
  0xee   :  { %217 = shalt.err (!%p214_p4)
}
  0xef   :  { %s218_s28 = scalar_lea.hbm %s293_s3, 256 }
  0xf0   :  { %p219_p5 = scmp.ne.s32.totalorder %s293_s3, %s218_s28  ;;  %p222_p6 = scmp.lt.u32.totalorder %s218_s28, %s293_s3 }
  0xf2   :  { %p224_p7 = pnand %p222_p6, %p219_p5 }
  0xf4   :  { %227 = shalt.err (!%p224_p7)
}
  0xf5   :  { %s231_s6 = smov 64   ;;  %s232_s7 = smov 4  }
  0xf6   :  { %157 = dma.vmem_to_hbm [thread:$0]  %s152_s1, 256, %s293_s3, [#allocation3], %s231_s6, %s231_s6, %s232_s7  }
  0xf7   :  { %228 = dma.done.wait [#allocation3], 256  }
  0xf8   :  { %229 = vsyncadd [#allocation3], 4294967040 }
  0xf9   :  { %161 = vsyncpa [#allocation3], 1 }

</bundles_post_ra>
